<compile_context>
chip_gen: v7x
topology: tpu7x:2x2x1
jax: 0.10.0
libtpu: 0.0.40
codegen_flags: <defaults>
</compile_context>

<pallas_src>
import functools

import jax
import jax.numpy as jnp
from jax.experimental import pallas as pl
from jax.experimental.pallas import tpu as pltpu


def _round_up(n, m):
    return ((n + m - 1) // m) * m


def _upsample2x_matrix(H2, W2, dtype):
    """(H2*W2, 4*H2*W2) 0/1 matrix M with M[q, p] = 1 iff coarse flat index q is the
    nearest-neighbour source (scale factor 2) of fine flat index p. Built host-side."""
    H, W = 2 * H2, 2 * W2
    q = jax.lax.broadcasted_iota(jnp.int32, (H2 * W2, H * W), 0)
    p = jax.lax.broadcasted_iota(jnp.int32, (H2 * W2, H * W), 1)
    src = (p // W // 2) * W2 + (p % W) // 2          # (h//2)*W2 + (w//2)
    return (q == src).astype(dtype)


def _im2col_taps(x, H, W, not_left, not_right):
    """x: (C, H*W) -> list of 9 taps, each (C, H*W), tap-major ((dy,dx) row-major).
    Implements 'same' (pad=1) zero padding via a flat zero-padded buffer + edge masks."""
    C, HW = x.shape
    zpad = jnp.zeros((C, W + 1), x.dtype)
    # Flat buffer with W+1 zeros on each side: tap (dy,dx) becomes a static lane slice at
    # offset (1+dy)*W + dx; the zeros cover the top/bottom image rows.
    xp = jnp.concatenate([zpad, x, zpad], axis=1)                 # (C, H*W + 2W + 2)
    taps = []
    for dy in (-1, 0, 1):
        for dx in (-1, 0, 1):
            start = (W + 1) + dy * W + dx
            t = xp[:, start:start + HW]
            if dx == -1:                      # left-edge wrap-around -> zero
                t = jnp.where(not_left, t, 0.0)
            elif dx == 1:                     # right-edge wrap-around -> zero
                t = jnp.where(not_right, t, 0.0)
            taps.append(t)
    return taps


def _upsample_block_kernel(x1_ref, x2_ref, up_ref, wu_ref, bu_ref, w1_ref,
                           b1_ref, w2_ref, b2_ref, o_ref, *, H, W):
    f32 = jnp.float32
    HW = H * W

    x1 = x1_ref[0].astype(f32)          # (Cin1_p, H2*W2)  deep features, half resolution
    x2 = x2_ref[0].astype(f32)          # (Cmid_p, H*W)    skip connection (channel padded)

    # Edge masks built once and shared by every im2col below.
    w_idx = jax.lax.broadcasted_iota(jnp.int32, (1, HW), 1) % W
    not_left = w_idx >= 1               # needed for dx == -1 (row wrap-around)
    not_right = w_idx <= W - 2          # needed for dx == +1

    # nn.Upsample(scale_factor=2, mode='nearest'): out[h, w] = in[h//2, w//2],
    # expressed as one selection matmul (no repeat/reshape relayout in-kernel).
    x1_up = jnp.dot(x1, up_ref[...].astype(f32), preferred_element_type=f32)  # (Cin1_p, H*W)

    # self.up conv: 3x3, pad=1, no activation. Single K=9*Cin matmul.
    in1_up = (jnp.dot(wu_ref[...].astype(f32),
                      jnp.concatenate(_im2col_taps(x1_up, H, W, not_left, not_right), axis=0),
                      preferred_element_type=f32)
              + bu_ref[...].astype(f32))

    # BasicBlock.conv1 on torch.cat([in1_up, inputs2], 1): the channel concat is folded into
    # the im2col row stack -> one K = 18*Cmid matmul against a pre-concatenated weight.
    cols = jnp.concatenate(_im2col_taps(in1_up, H, W, not_left, not_right)
                           + _im2col_taps(x2, H, W, not_left, not_right), axis=0)
    h = jnp.maximum(jnp.dot(w1_ref[...].astype(f32), cols, preferred_element_type=f32)
                    + b1_ref[...].astype(f32), 0.0)

    # BasicBlock.conv2 + ReLU.
    out = jnp.maximum(
        jnp.dot(w2_ref[...].astype(f32),
                jnp.concatenate(_im2col_taps(h, H, W, not_left, not_right), axis=0),
                preferred_element_type=f32)
        + b2_ref[...].astype(f32), 0.0)

    o_ref[0] = out.astype(o_ref.dtype)


def _conv_weight_mat(w, b, cin_pad, cout_pad):
    """HWIO (3,3,Cin,Cout) -> ((cout_pad, 9*cin_pad) matmul weights, (cout_pad, 1) bias).
    Row ordering of the 9*cin_pad axis matches _im2col_taps (tap-major, channel-minor)."""
    kh, kw, cin, cout = w.shape
    w = jnp.pad(w, ((0, 0), (0, 0), (0, cin_pad - cin), (0, cout_pad - cout)))
    wmat = jnp.transpose(w, (3, 0, 1, 2)).reshape(cout_pad, kh * kw * cin_pad)
    bcol = jnp.pad(b, (0, cout_pad - cout)).reshape(cout_pad, 1)
    return wmat, bcol


def upsample_block_forward(params, inputs1_nchw, inputs2_nchw):
    """UpsampleBlock forward. Inputs/outputs are NCHW to mirror PyTorch."""
    B, c_in1, H2, W2 = inputs1_nchw.shape
    _, c_in2, H, W = inputs2_nchw.shape
    if H != 2 * H2 or W != 2 * W2:
        raise ValueError(
            f"input2 size ({inputs2_nchw.shape[2:]}) does not match upscaled "
            f"inputs1 size ({(2 * H2, 2 * W2)})")

    cout = params["w_up"].shape[-1]
    assert c_in2 == cout and params["w1"].shape[2] == 2 * cout

    cin1_p = _round_up(c_in1, 8)   # padded up-conv input channels (num_filt)
    cmid_p = _round_up(cout, 8)    # padded width of in1_up / inputs2 / h
    hw = H * W

    # Lane-dense activations: (B, C, H*W) with channels zero-padded to sublane tiles.
    x1 = jnp.pad(inputs1_nchw.reshape(B, c_in1, H2 * W2),
                 ((0, 0), (0, cin1_p - c_in1), (0, 0)))
    x2 = jnp.pad(inputs2_nchw.reshape(B, c_in2, hw),
                 ((0, 0), (0, cmid_p - c_in2), (0, 0)))

    # Host-built nearest-upsample selection matrix (constant, DMAed once into VMEM).
    up = _upsample2x_matrix(H2, W2, jnp.float32)                  # (H2*W2, H*W)

    # Weight matrices (zero padded so every in-kernel operand is 8-sublane aligned).
    wu, bu = _conv_weight_mat(params["w_up"], params["b_up"], cin1_p, cmid_p)
    w1a, b1 = _conv_weight_mat(params["w1"][:, :, :cout, :], params["b1"], cmid_p, cmid_p)
    w1b, _ = _conv_weight_mat(params["w1"][:, :, cout:, :],
                              jnp.zeros_like(params["b1"]), cmid_p, cmid_p)
    w1 = jnp.concatenate([w1a, w1b], axis=1)                      # (cmid_p, 18*cmid_p)
    w2m, b2 = _conv_weight_mat(params["w2"], params["b2"], cmid_p, cout)

    kern = functools.partial(_upsample_block_kernel, H=H, W=W)
    out_flat = pl.pallas_call(
        kern,
        out_shape=jax.ShapeDtypeStruct((B, cout, hw), inputs2_nchw.dtype),
        grid_spec=pltpu.PrefetchScalarGridSpec(
            num_scalar_prefetch=0,
            grid=(B,),
            in_specs=[
                pl.BlockSpec((1, cin1_p, H2 * W2), lambda i: (i, 0, 0)),
                pl.BlockSpec((1, cmid_p, hw), lambda i: (i, 0, 0)),
                pl.BlockSpec(up.shape, lambda i: (0, 0)),
                pl.BlockSpec(wu.shape, lambda i: (0, 0)),
                pl.BlockSpec(bu.shape, lambda i: (0, 0)),
                pl.BlockSpec(w1.shape, lambda i: (0, 0)),
                pl.BlockSpec(b1.shape, lambda i: (0, 0)),
                pl.BlockSpec(w2m.shape, lambda i: (0, 0)),
                pl.BlockSpec(b2.shape, lambda i: (0, 0)),
            ],
            out_specs=pl.BlockSpec((1, cout, hw), lambda i: (i, 0, 0)),
        ),
        compiler_params=pltpu.CompilerParams(
            dimension_semantics=("parallel",)),
    )(x1, x2, up, wu, bu, w1, b1, w2m, b2)
    return out_flat.reshape(B, cout, H, W)


def init_upsample_block_params(key, out_channels, same_num_filt=False,
                               dtype=jnp.float32):
    """Deterministic synthetic parameters with the module's shapes (HWIO layout)."""
    num_filt = out_channels if same_num_filt else out_channels * 2
    ks = jax.random.split(key, 6)

    def conv_init(kw, kb, cin, cout):
        scale = 1.0 / jnp.sqrt(jnp.asarray(cin * 9, dtype))
        w = jax.random.uniform(kw, (3, 3, cin, cout), dtype, -scale, scale)
        b = jax.random.uniform(kb, (cout,), dtype, -scale, scale)
        return w, b

    w_up, b_up = conv_init(ks[0], ks[1], num_filt, out_channels)          # up conv
    w1, b1 = conv_init(ks[2], ks[3], out_channels * 2, out_channels)      # BasicBlock conv1
    w2, b2 = conv_init(ks[4], ks[5], out_channels, out_channels)          # BasicBlock conv2
    return dict(w_up=w_up, b_up=b_up, w1=w1, b1=b1, w2=w2, b2=b2)


def _reference_forward(params, inputs1_nchw, inputs2_nchw):
    """Pure-JAX/XLA reference with identical semantics (sanity check only)."""
    x1 = jnp.transpose(inputs1_nchw, (0, 2, 3, 1))
    x2 = jnp.transpose(inputs2_nchw, (0, 2, 3, 1))
    x1_up = jnp.repeat(jnp.repeat(x1, 2, axis=1), 2, axis=2)

    def conv(x, w, b):
        y = jax.lax.conv_general_dilated(
            x, w, window_strides=(1, 1), padding="SAME",
            dimension_numbers=("NHWC", "HWIO", "NHWC"))
        return y + b

    in1_up = conv(x1_up, params["w_up"], params["b_up"])
    cat = jnp.concatenate([in1_up, x2], axis=-1)
    h = jax.nn.relu(conv(cat, params["w1"], params["b1"]))
    out = jax.nn.relu(conv(h, params["w2"], params["b2"]))
    return jnp.transpose(out, (0, 3, 1, 2))


if __name__ == "__main__":
    key = jax.random.PRNGKey(0)
    k_param, k_x1, k_x2 = jax.random.split(key, 3)

    out_channels = 4                 # UpsampleBlock(out_channels=4, 'nearest')
    num_filt = out_channels * 2      # same_num_filt=False
    B, H, W = 2, 16, 16

    # inputs1: deeper feature map at half resolution with num_filt channels (NCHW)
    inputs1 = jax.random.normal(k_x1, (B, num_filt, H // 2, W // 2), jnp.float32)
    # inputs2: skip connection at full resolution with out_channels channels (NCHW)
    inputs2 = jax.random.normal(k_x2, (B, out_channels, H, W), jnp.float32)

    params = init_upsample_block_params(k_param, out_channels)

    out = jax.jit(upsample_block_forward)(params, inputs1, inputs2)
    jax.block_until_ready(out)
    assert out.shape == (B, out_channels, H, W), out.shape

    ref = _reference_forward(params, inputs1, inputs2)
    assert jnp.allclose(out, ref, atol=5e-2, rtol=5e-2), (
        "max abs err vs reference: %f" % float(jnp.max(jnp.abs(out - ref))))

    print("KERNEL_OK")
</pallas_src>

<mosaic_0001>
module attributes {stable_mosaic.version = 11 : i64} {
  func.func @_upsample_block_kernel(%arg0: i32, %arg1: memref<1x8x64xf32, #tpu.memory_space<vmem>>, %arg2: memref<1x8x256xf32, #tpu.memory_space<vmem>>, %arg3: memref<64x256xf32, #tpu.memory_space<vmem>>, %arg4: memref<8x72xf32, #tpu.memory_space<vmem>>, %arg5: memref<8x1xf32, #tpu.memory_space<vmem>>, %arg6: memref<8x144xf32, #tpu.memory_space<vmem>>, %arg7: memref<8x1xf32, #tpu.memory_space<vmem>>, %arg8: memref<4x72xf32, #tpu.memory_space<vmem>>, %arg9: memref<4x1xf32, #tpu.memory_space<vmem>>, %arg10: memref<1x4x256xf32, #tpu.memory_space<vmem>>) attributes {dimension_semantics = [#tpu.dimension_semantics<parallel>], iteration_bounds = array<i64: 2>, scalar_prefetch = 0 : i64, scratch_operands = 0 : i64, tpu.core_type = #tpu.core_type<tc>, window_params = [{transform_indices = @transform_0, window_bounds = array<i64: 1, 8, 64>}, {transform_indices = @transform_1, window_bounds = array<i64: 1, 8, 256>}, {pipeline_mode = #tpu.pipeline_mode<synchronous>, transform_indices = @transform_2, window_bounds = array<i64: 64, 256>}, {pipeline_mode = #tpu.pipeline_mode<synchronous>, transform_indices = @transform_3, window_bounds = array<i64: 8, 72>}, {pipeline_mode = #tpu.pipeline_mode<synchronous>, transform_indices = @transform_4, window_bounds = array<i64: 8, 1>}, {pipeline_mode = #tpu.pipeline_mode<synchronous>, transform_indices = @transform_5, window_bounds = array<i64: 8, 144>}, {pipeline_mode = #tpu.pipeline_mode<synchronous>, transform_indices = @transform_6, window_bounds = array<i64: 8, 1>}, {pipeline_mode = #tpu.pipeline_mode<synchronous>, transform_indices = @transform_7, window_bounds = array<i64: 4, 72>}, {pipeline_mode = #tpu.pipeline_mode<synchronous>, transform_indices = @transform_8, window_bounds = array<i64: 4, 1>}, {transform_indices = @transform_9, window_bounds = array<i64: 1, 4, 256>}]} {
    %c0 = arith.constant 0 : index
    %c0_0 = arith.constant 0 : index
    %c0_1 = arith.constant 0 : index
    %0 = vector.load %arg1[%c0, %c0_0, %c0_1] : memref<1x8x64xf32, #tpu.memory_space<vmem>>, vector<1x8x64xf32>
    %1 = vector.shape_cast %0 : vector<1x8x64xf32> to vector<8x64xf32>
    %c0_2 = arith.constant 0 : index
    %c0_3 = arith.constant 0 : index
    %c0_4 = arith.constant 0 : index
    %2 = vector.load %arg2[%c0_2, %c0_3, %c0_4] : memref<1x8x256xf32, #tpu.memory_space<vmem>>, vector<1x8x256xf32>
    %3 = vector.shape_cast %2 : vector<1x8x256xf32> to vector<8x256xf32>
    %4 = tpu.iota {dimensions = array<i32: 1>} : vector<1x256xi32>
    %c16_i32 = arith.constant 16 : i32
    %c0_i32 = arith.constant 0 : i32
    %5 = arith.cmpi eq, %c16_i32, %c0_i32 : i32
    %c1_i32 = arith.constant 1 : i32
    %6 = arith.select %5, %c1_i32, %c16_i32 : i32
    %7 = vector.broadcast %6 : i32 to vector<1x256xi32>
    %8 = arith.remsi %4, %7 : vector<1x256xi32>
    %c0_i32_5 = arith.constant 0 : i32
    %9 = vector.broadcast %c0_i32_5 : i32 to vector<1x256xi32>
    %10 = arith.cmpi ne, %8, %9 : vector<1x256xi32>
    %c0_i32_6 = arith.constant 0 : i32
    %11 = vector.broadcast %c0_i32_6 : i32 to vector<1x256xi32>
    %12 = arith.cmpi slt, %8, %11 : vector<1x256xi32>
    %c0_i32_7 = arith.constant 0 : i32
    %13 = arith.cmpi slt, %6, %c0_i32_7 : i32
    %14 = vector.broadcast %13 : i1 to vector<1x256xi1>
    %15 = vector.broadcast %14 : vector<1x256xi1> to vector<1x256xi1>
    %16 = arith.xori %12, %15 : vector<1x256xi1>
    %17 = arith.andi %16, %10 : vector<1x256xi1>
    %18 = vector.broadcast %6 : i32 to vector<1x256xi32>
    %19 = arith.addi %8, %18 : vector<1x256xi32>
    %20 = arith.select %17, %19, %8 : vector<1x256xi1>, vector<1x256xi32>
    %c1_i32_8 = arith.constant 1 : i32
    %21 = vector.broadcast %c1_i32_8 : i32 to vector<1x256xi32>
    %22 = arith.cmpi sge, %20, %21 : vector<1x256xi32>
    %c14_i32 = arith.constant 14 : i32
    %23 = vector.broadcast %c14_i32 : i32 to vector<1x256xi32>
    %24 = arith.cmpi sle, %20, %23 : vector<1x256xi32>
    %c0_9 = arith.constant 0 : index
    %c0_10 = arith.constant 0 : index
    %25 = vector.load %arg3[%c0_9, %c0_10] : memref<64x256xf32, #tpu.memory_space<vmem>>, vector<64x256xf32>
    %cst = arith.constant dense<0.000000e+00> : vector<8x256xf32>
    %26 = tpu.matmul %1, %25, %cst {dimension_numbers = #tpu.dot_dimension_numbers<[1], [0], [0], [1], [0, 0, 1, 1], [], []>} : vector<8x64xf32>, vector<64x256xf32>, vector<8x256xf32> -> vector<8x256xf32>
    %c0_11 = arith.constant 0 : index
    %c0_12 = arith.constant 0 : index
    %27 = vector.load %arg4[%c0_11, %c0_12] : memref<8x72xf32, #tpu.memory_space<vmem>>, vector<8x72xf32>
    %cst_13 = arith.constant 0.000000e+00 : f32
    %28 = vector.broadcast %cst_13 : f32 to vector<8x17xf32>
    %29 = tpu.concatenate %28, %26, %28 in 1 : vector<8x17xf32>, vector<8x256xf32>, vector<8x17xf32> -> vector<8x290xf32>
    %30 = vector.extract_strided_slice %29 {offsets = [0, 0], sizes = [8, 256], strides = [1, 1]} : vector<8x290xf32> to vector<8x256xf32>
    %cst_14 = arith.constant 0.000000e+00 : f32
    %31 = vector.shape_cast %22 : vector<1x256xi1> to vector<1x256xi1>
    %32 = vector.broadcast %31 : vector<1x256xi1> to vector<8x256xi1>
    %33 = vector.broadcast %cst_14 : f32 to vector<8x256xf32>
    %34 = arith.select %32, %30, %33 : vector<8x256xi1>, vector<8x256xf32>
    %35 = vector.extract_strided_slice %29 {offsets = [0, 1], sizes = [8, 256], strides = [1, 1]} : vector<8x290xf32> to vector<8x256xf32>
    %36 = vector.extract_strided_slice %29 {offsets = [0, 2], sizes = [8, 256], strides = [1, 1]} : vector<8x290xf32> to vector<8x256xf32>
    %cst_15 = arith.constant 0.000000e+00 : f32
    %37 = vector.shape_cast %24 : vector<1x256xi1> to vector<1x256xi1>
    %38 = vector.broadcast %37 : vector<1x256xi1> to vector<8x256xi1>
    %39 = vector.broadcast %cst_15 : f32 to vector<8x256xf32>
    %40 = arith.select %38, %36, %39 : vector<8x256xi1>, vector<8x256xf32>
    %41 = vector.extract_strided_slice %29 {offsets = [0, 16], sizes = [8, 256], strides = [1, 1]} : vector<8x290xf32> to vector<8x256xf32>
    %cst_16 = arith.constant 0.000000e+00 : f32
    %42 = vector.shape_cast %22 : vector<1x256xi1> to vector<1x256xi1>
    %43 = vector.broadcast %42 : vector<1x256xi1> to vector<8x256xi1>
    %44 = vector.broadcast %cst_16 : f32 to vector<8x256xf32>
    %45 = arith.select %43, %41, %44 : vector<8x256xi1>, vector<8x256xf32>
    %46 = vector.extract_strided_slice %29 {offsets = [0, 17], sizes = [8, 256], strides = [1, 1]} : vector<8x290xf32> to vector<8x256xf32>
    %47 = vector.extract_strided_slice %29 {offsets = [0, 18], sizes = [8, 256], strides = [1, 1]} : vector<8x290xf32> to vector<8x256xf32>
    %cst_17 = arith.constant 0.000000e+00 : f32
    %48 = vector.shape_cast %24 : vector<1x256xi1> to vector<1x256xi1>
    %49 = vector.broadcast %48 : vector<1x256xi1> to vector<8x256xi1>
    %50 = vector.broadcast %cst_17 : f32 to vector<8x256xf32>
    %51 = arith.select %49, %47, %50 : vector<8x256xi1>, vector<8x256xf32>
    %52 = vector.extract_strided_slice %29 {offsets = [0, 32], sizes = [8, 256], strides = [1, 1]} : vector<8x290xf32> to vector<8x256xf32>
    %cst_18 = arith.constant 0.000000e+00 : f32
    %53 = vector.shape_cast %22 : vector<1x256xi1> to vector<1x256xi1>
    %54 = vector.broadcast %53 : vector<1x256xi1> to vector<8x256xi1>
    %55 = vector.broadcast %cst_18 : f32 to vector<8x256xf32>
    %56 = arith.select %54, %52, %55 : vector<8x256xi1>, vector<8x256xf32>
    %57 = vector.extract_strided_slice %29 {offsets = [0, 33], sizes = [8, 256], strides = [1, 1]} : vector<8x290xf32> to vector<8x256xf32>
    %58 = vector.extract_strided_slice %29 {offsets = [0, 34], sizes = [8, 256], strides = [1, 1]} : vector<8x290xf32> to vector<8x256xf32>
    %cst_19 = arith.constant 0.000000e+00 : f32
    %59 = vector.shape_cast %24 : vector<1x256xi1> to vector<1x256xi1>
    %60 = vector.broadcast %59 : vector<1x256xi1> to vector<8x256xi1>
    %61 = vector.broadcast %cst_19 : f32 to vector<8x256xf32>
    %62 = arith.select %60, %58, %61 : vector<8x256xi1>, vector<8x256xf32>
    %63 = tpu.concatenate %34, %35, %40, %45, %46, %51, %56, %57, %62 in 0 : vector<8x256xf32>, vector<8x256xf32>, vector<8x256xf32>, vector<8x256xf32>, vector<8x256xf32>, vector<8x256xf32>, vector<8x256xf32>, vector<8x256xf32>, vector<8x256xf32> -> vector<72x256xf32>
    %cst_20 = arith.constant dense<0.000000e+00> : vector<8x256xf32>
    %64 = tpu.matmul %27, %63, %cst_20 {dimension_numbers = #tpu.dot_dimension_numbers<[1], [0], [0], [1], [0, 0, 1, 1], [], []>} : vector<8x72xf32>, vector<72x256xf32>, vector<8x256xf32> -> vector<8x256xf32>
    %c0_21 = arith.constant 0 : index
    %c0_22 = arith.constant 0 : index
    %65 = vector.load %arg5[%c0_21, %c0_22] : memref<8x1xf32, #tpu.memory_space<vmem>>, vector<8x1xf32>
    %66 = vector.broadcast %65 : vector<8x1xf32> to vector<8x256xf32>
    %67 = arith.addf %64, %66 : vector<8x256xf32>
    %cst_23 = arith.constant 0.000000e+00 : f32
    %68 = vector.broadcast %cst_23 : f32 to vector<8x17xf32>
    %69 = tpu.concatenate %68, %67, %68 in 1 : vector<8x17xf32>, vector<8x256xf32>, vector<8x17xf32> -> vector<8x290xf32>
    %70 = vector.extract_strided_slice %69 {offsets = [0, 0], sizes = [8, 256], strides = [1, 1]} : vector<8x290xf32> to vector<8x256xf32>
    %cst_24 = arith.constant 0.000000e+00 : f32
    %71 = vector.shape_cast %22 : vector<1x256xi1> to vector<1x256xi1>
    %72 = vector.broadcast %71 : vector<1x256xi1> to vector<8x256xi1>
    %73 = vector.broadcast %cst_24 : f32 to vector<8x256xf32>
    %74 = arith.select %72, %70, %73 : vector<8x256xi1>, vector<8x256xf32>
    %75 = vector.extract_strided_slice %69 {offsets = [0, 1], sizes = [8, 256], strides = [1, 1]} : vector<8x290xf32> to vector<8x256xf32>
    %76 = vector.extract_strided_slice %69 {offsets = [0, 2], sizes = [8, 256], strides = [1, 1]} : vector<8x290xf32> to vector<8x256xf32>
    %cst_25 = arith.constant 0.000000e+00 : f32
    %77 = vector.shape_cast %24 : vector<1x256xi1> to vector<1x256xi1>
    %78 = vector.broadcast %77 : vector<1x256xi1> to vector<8x256xi1>
    %79 = vector.broadcast %cst_25 : f32 to vector<8x256xf32>
    %80 = arith.select %78, %76, %79 : vector<8x256xi1>, vector<8x256xf32>
    %81 = vector.extract_strided_slice %69 {offsets = [0, 16], sizes = [8, 256], strides = [1, 1]} : vector<8x290xf32> to vector<8x256xf32>
    %cst_26 = arith.constant 0.000000e+00 : f32
    %82 = vector.shape_cast %22 : vector<1x256xi1> to vector<1x256xi1>
    %83 = vector.broadcast %82 : vector<1x256xi1> to vector<8x256xi1>
    %84 = vector.broadcast %cst_26 : f32 to vector<8x256xf32>
    %85 = arith.select %83, %81, %84 : vector<8x256xi1>, vector<8x256xf32>
    %86 = vector.extract_strided_slice %69 {offsets = [0, 17], sizes = [8, 256], strides = [1, 1]} : vector<8x290xf32> to vector<8x256xf32>
    %87 = vector.extract_strided_slice %69 {offsets = [0, 18], sizes = [8, 256], strides = [1, 1]} : vector<8x290xf32> to vector<8x256xf32>
    %cst_27 = arith.constant 0.000000e+00 : f32
    %88 = vector.shape_cast %24 : vector<1x256xi1> to vector<1x256xi1>
    %89 = vector.broadcast %88 : vector<1x256xi1> to vector<8x256xi1>
    %90 = vector.broadcast %cst_27 : f32 to vector<8x256xf32>
    %91 = arith.select %89, %87, %90 : vector<8x256xi1>, vector<8x256xf32>
    %92 = vector.extract_strided_slice %69 {offsets = [0, 32], sizes = [8, 256], strides = [1, 1]} : vector<8x290xf32> to vector<8x256xf32>
    %cst_28 = arith.constant 0.000000e+00 : f32
    %93 = vector.shape_cast %22 : vector<1x256xi1> to vector<1x256xi1>
    %94 = vector.broadcast %93 : vector<1x256xi1> to vector<8x256xi1>
    %95 = vector.broadcast %cst_28 : f32 to vector<8x256xf32>
    %96 = arith.select %94, %92, %95 : vector<8x256xi1>, vector<8x256xf32>
    %97 = vector.extract_strided_slice %69 {offsets = [0, 33], sizes = [8, 256], strides = [1, 1]} : vector<8x290xf32> to vector<8x256xf32>
    %98 = vector.extract_strided_slice %69 {offsets = [0, 34], sizes = [8, 256], strides = [1, 1]} : vector<8x290xf32> to vector<8x256xf32>
    %cst_29 = arith.constant 0.000000e+00 : f32
    %99 = vector.shape_cast %24 : vector<1x256xi1> to vector<1x256xi1>
    %100 = vector.broadcast %99 : vector<1x256xi1> to vector<8x256xi1>
    %101 = vector.broadcast %cst_29 : f32 to vector<8x256xf32>
    %102 = arith.select %100, %98, %101 : vector<8x256xi1>, vector<8x256xf32>
    %cst_30 = arith.constant 0.000000e+00 : f32
    %103 = vector.broadcast %cst_30 : f32 to vector<8x17xf32>
    %104 = tpu.concatenate %103, %3, %103 in 1 : vector<8x17xf32>, vector<8x256xf32>, vector<8x17xf32> -> vector<8x290xf32>
    %105 = vector.extract_strided_slice %104 {offsets = [0, 0], sizes = [8, 256], strides = [1, 1]} : vector<8x290xf32> to vector<8x256xf32>
    %cst_31 = arith.constant 0.000000e+00 : f32
    %106 = vector.shape_cast %22 : vector<1x256xi1> to vector<1x256xi1>
    %107 = vector.broadcast %106 : vector<1x256xi1> to vector<8x256xi1>
    %108 = vector.broadcast %cst_31 : f32 to vector<8x256xf32>
    %109 = arith.select %107, %105, %108 : vector<8x256xi1>, vector<8x256xf32>
    %110 = vector.extract_strided_slice %104 {offsets = [0, 1], sizes = [8, 256], strides = [1, 1]} : vector<8x290xf32> to vector<8x256xf32>
    %111 = vector.extract_strided_slice %104 {offsets = [0, 2], sizes = [8, 256], strides = [1, 1]} : vector<8x290xf32> to vector<8x256xf32>
    %cst_32 = arith.constant 0.000000e+00 : f32
    %112 = vector.shape_cast %24 : vector<1x256xi1> to vector<1x256xi1>
    %113 = vector.broadcast %112 : vector<1x256xi1> to vector<8x256xi1>
    %114 = vector.broadcast %cst_32 : f32 to vector<8x256xf32>
    %115 = arith.select %113, %111, %114 : vector<8x256xi1>, vector<8x256xf32>
    %116 = vector.extract_strided_slice %104 {offsets = [0, 16], sizes = [8, 256], strides = [1, 1]} : vector<8x290xf32> to vector<8x256xf32>
    %cst_33 = arith.constant 0.000000e+00 : f32
    %117 = vector.shape_cast %22 : vector<1x256xi1> to vector<1x256xi1>
    %118 = vector.broadcast %117 : vector<1x256xi1> to vector<8x256xi1>
    %119 = vector.broadcast %cst_33 : f32 to vector<8x256xf32>
    %120 = arith.select %118, %116, %119 : vector<8x256xi1>, vector<8x256xf32>
    %121 = vector.extract_strided_slice %104 {offsets = [0, 17], sizes = [8, 256], strides = [1, 1]} : vector<8x290xf32> to vector<8x256xf32>
    %122 = vector.extract_strided_slice %104 {offsets = [0, 18], sizes = [8, 256], strides = [1, 1]} : vector<8x290xf32> to vector<8x256xf32>
    %cst_34 = arith.constant 0.000000e+00 : f32
    %123 = vector.shape_cast %24 : vector<1x256xi1> to vector<1x256xi1>
    %124 = vector.broadcast %123 : vector<1x256xi1> to vector<8x256xi1>
    %125 = vector.broadcast %cst_34 : f32 to vector<8x256xf32>
    %126 = arith.select %124, %122, %125 : vector<8x256xi1>, vector<8x256xf32>
    %127 = vector.extract_strided_slice %104 {offsets = [0, 32], sizes = [8, 256], strides = [1, 1]} : vector<8x290xf32> to vector<8x256xf32>
    %cst_35 = arith.constant 0.000000e+00 : f32
    %128 = vector.shape_cast %22 : vector<1x256xi1> to vector<1x256xi1>
    %129 = vector.broadcast %128 : vector<1x256xi1> to vector<8x256xi1>
    %130 = vector.broadcast %cst_35 : f32 to vector<8x256xf32>
    %131 = arith.select %129, %127, %130 : vector<8x256xi1>, vector<8x256xf32>
    %132 = vector.extract_strided_slice %104 {offsets = [0, 33], sizes = [8, 256], strides = [1, 1]} : vector<8x290xf32> to vector<8x256xf32>
    %133 = vector.extract_strided_slice %104 {offsets = [0, 34], sizes = [8, 256], strides = [1, 1]} : vector<8x290xf32> to vector<8x256xf32>
    %cst_36 = arith.constant 0.000000e+00 : f32
    %134 = vector.shape_cast %24 : vector<1x256xi1> to vector<1x256xi1>
    %135 = vector.broadcast %134 : vector<1x256xi1> to vector<8x256xi1>
    %136 = vector.broadcast %cst_36 : f32 to vector<8x256xf32>
    %137 = arith.select %135, %133, %136 : vector<8x256xi1>, vector<8x256xf32>
    %138 = tpu.concatenate %74, %75, %80, %85, %86, %91, %96, %97, %102, %109, %110, %115, %120, %121, %126, %131 in 0 : vector<8x256xf32>, vector<8x256xf32>, vector<8x256xf32>, vector<8x256xf32>, vector<8x256xf32>, vector<8x256xf32>, vector<8x256xf32>, vector<8x256xf32>, vector<8x256xf32>, vector<8x256xf32>, vector<8x256xf32>, vector<8x256xf32>, vector<8x256xf32>, vector<8x256xf32>, vector<8x256xf32>, vector<8x256xf32> -> vector<128x256xf32>
    %139 = tpu.concatenate %132, %137 in 0 : vector<8x256xf32>, vector<8x256xf32> -> vector<16x256xf32>
    %140 = tpu.concatenate %138, %139 in 0 : vector<128x256xf32>, vector<16x256xf32> -> vector<144x256xf32>
    %c0_37 = arith.constant 0 : index
    %c0_38 = arith.constant 0 : index
    %141 = vector.load %arg6[%c0_37, %c0_38] : memref<8x144xf32, #tpu.memory_space<vmem>>, vector<8x144xf32>
    %cst_39 = arith.constant dense<0.000000e+00> : vector<8x256xf32>
    %142 = tpu.matmul %141, %140, %cst_39 {dimension_numbers = #tpu.dot_dimension_numbers<[1], [0], [0], [1], [0, 0, 1, 1], [], []>} : vector<8x144xf32>, vector<144x256xf32>, vector<8x256xf32> -> vector<8x256xf32>
    %c0_40 = arith.constant 0 : index
    %c0_41 = arith.constant 0 : index
    %143 = vector.load %arg7[%c0_40, %c0_41] : memref<8x1xf32, #tpu.memory_space<vmem>>, vector<8x1xf32>
    %144 = vector.broadcast %143 : vector<8x1xf32> to vector<8x256xf32>
    %145 = arith.addf %142, %144 : vector<8x256xf32>
    %cst_42 = arith.constant 0.000000e+00 : f32
    %146 = vector.broadcast %cst_42 : f32 to vector<8x256xf32>
    %147 = arith.maximumf %145, %146 : vector<8x256xf32>
    %c0_43 = arith.constant 0 : index
    %c0_44 = arith.constant 0 : index
    %148 = vector.load %arg8[%c0_43, %c0_44] : memref<4x72xf32, #tpu.memory_space<vmem>>, vector<4x72xf32>
    %cst_45 = arith.constant 0.000000e+00 : f32
    %149 = vector.broadcast %cst_45 : f32 to vector<8x17xf32>
    %150 = tpu.concatenate %149, %147, %149 in 1 : vector<8x17xf32>, vector<8x256xf32>, vector<8x17xf32> -> vector<8x290xf32>
    %151 = vector.extract_strided_slice %150 {offsets = [0, 0], sizes = [8, 256], strides = [1, 1]} : vector<8x290xf32> to vector<8x256xf32>
    %cst_46 = arith.constant 0.000000e+00 : f32
    %152 = vector.shape_cast %22 : vector<1x256xi1> to vector<1x256xi1>
    %153 = vector.broadcast %152 : vector<1x256xi1> to vector<8x256xi1>
    %154 = vector.broadcast %cst_46 : f32 to vector<8x256xf32>
    %155 = arith.select %153, %151, %154 : vector<8x256xi1>, vector<8x256xf32>
    %156 = vector.extract_strided_slice %150 {offsets = [0, 1], sizes = [8, 256], strides = [1, 1]} : vector<8x290xf32> to vector<8x256xf32>
    %157 = vector.extract_strided_slice %150 {offsets = [0, 2], sizes = [8, 256], strides = [1, 1]} : vector<8x290xf32> to vector<8x256xf32>
    %cst_47 = arith.constant 0.000000e+00 : f32
    %158 = vector.shape_cast %24 : vector<1x256xi1> to vector<1x256xi1>
    %159 = vector.broadcast %158 : vector<1x256xi1> to vector<8x256xi1>
    %160 = vector.broadcast %cst_47 : f32 to vector<8x256xf32>
    %161 = arith.select %159, %157, %160 : vector<8x256xi1>, vector<8x256xf32>
    %162 = vector.extract_strided_slice %150 {offsets = [0, 16], sizes = [8, 256], strides = [1, 1]} : vector<8x290xf32> to vector<8x256xf32>
    %cst_48 = arith.constant 0.000000e+00 : f32
    %163 = vector.shape_cast %22 : vector<1x256xi1> to vector<1x256xi1>
    %164 = vector.broadcast %163 : vector<1x256xi1> to vector<8x256xi1>
    %165 = vector.broadcast %cst_48 : f32 to vector<8x256xf32>
    %166 = arith.select %164, %162, %165 : vector<8x256xi1>, vector<8x256xf32>
    %167 = vector.extract_strided_slice %150 {offsets = [0, 17], sizes = [8, 256], strides = [1, 1]} : vector<8x290xf32> to vector<8x256xf32>
    %168 = vector.extract_strided_slice %150 {offsets = [0, 18], sizes = [8, 256], strides = [1, 1]} : vector<8x290xf32> to vector<8x256xf32>
    %cst_49 = arith.constant 0.000000e+00 : f32
    %169 = vector.shape_cast %24 : vector<1x256xi1> to vector<1x256xi1>
    %170 = vector.broadcast %169 : vector<1x256xi1> to vector<8x256xi1>
    %171 = vector.broadcast %cst_49 : f32 to vector<8x256xf32>
    %172 = arith.select %170, %168, %171 : vector<8x256xi1>, vector<8x256xf32>
    %173 = vector.extract_strided_slice %150 {offsets = [0, 32], sizes = [8, 256], strides = [1, 1]} : vector<8x290xf32> to vector<8x256xf32>
    %cst_50 = arith.constant 0.000000e+00 : f32
    %174 = vector.shape_cast %22 : vector<1x256xi1> to vector<1x256xi1>
    %175 = vector.broadcast %174 : vector<1x256xi1> to vector<8x256xi1>
    %176 = vector.broadcast %cst_50 : f32 to vector<8x256xf32>
    %177 = arith.select %175, %173, %176 : vector<8x256xi1>, vector<8x256xf32>
    %178 = vector.extract_strided_slice %150 {offsets = [0, 33], sizes = [8, 256], strides = [1, 1]} : vector<8x290xf32> to vector<8x256xf32>
    %179 = vector.extract_strided_slice %150 {offsets = [0, 34], sizes = [8, 256], strides = [1, 1]} : vector<8x290xf32> to vector<8x256xf32>
    %cst_51 = arith.constant 0.000000e+00 : f32
    %180 = vector.shape_cast %24 : vector<1x256xi1> to vector<1x256xi1>
    %181 = vector.broadcast %180 : vector<1x256xi1> to vector<8x256xi1>
    %182 = vector.broadcast %cst_51 : f32 to vector<8x256xf32>
    %183 = arith.select %181, %179, %182 : vector<8x256xi1>, vector<8x256xf32>
    %184 = tpu.concatenate %155, %156, %161, %166, %167, %172, %177, %178, %183 in 0 : vector<8x256xf32>, vector<8x256xf32>, vector<8x256xf32>, vector<8x256xf32>, vector<8x256xf32>, vector<8x256xf32>, vector<8x256xf32>, vector<8x256xf32>, vector<8x256xf32> -> vector<72x256xf32>
    %cst_52 = arith.constant dense<0.000000e+00> : vector<4x256xf32>
    %185 = tpu.matmul %148, %184, %cst_52 {dimension_numbers = #tpu.dot_dimension_numbers<[1], [0], [0], [1], [0, 0, 1, 1], [], []>} : vector<4x72xf32>, vector<72x256xf32>, vector<4x256xf32> -> vector<4x256xf32>
    %c0_53 = arith.constant 0 : index
    %c0_54 = arith.constant 0 : index
    %186 = vector.load %arg9[%c0_53, %c0_54] : memref<4x1xf32, #tpu.memory_space<vmem>>, vector<4x1xf32>
    %187 = vector.broadcast %186 : vector<4x1xf32> to vector<4x256xf32>
    %188 = arith.addf %185, %187 : vector<4x256xf32>
    %cst_55 = arith.constant 0.000000e+00 : f32
    %189 = vector.broadcast %cst_55 : f32 to vector<4x256xf32>
    %190 = arith.maximumf %188, %189 : vector<4x256xf32>
    %c0_56 = arith.constant 0 : index
    %c0_57 = arith.constant 0 : index
    %c0_58 = arith.constant 0 : index
    %191 = vector.load %arg10[%c0_56, %c0_57, %c0_58] : memref<1x4x256xf32, #tpu.memory_space<vmem>>, vector<1x4x256xf32>
    %192 = vector.shape_cast %191 : vector<1x4x256xf32> to vector<4x256xf32>
    %193 = vector.shape_cast %190 : vector<4x256xf32> to vector<1x4x256xf32>
    tpu.vector_store %arg10[%c0_56, %c0_57, %c0_58], %193 {strides = array<i32>} : memref<1x4x256xf32, #tpu.memory_space<vmem>>, vector<1x4x256xf32>,
    return
  }
  func.func @transform_0(%arg0: i32) -> (i32, i32, i32) {
    %c0_i32 = arith.constant 0 : i32
    %c0_i32_0 = arith.constant 0 : i32
    %c0_i32_1 = arith.constant 0 : i32
    return %arg0, %c0_i32, %c0_i32_0 : i32, i32, i32
  }
  func.func @transform_1(%arg0: i32) -> (i32, i32, i32) {
    %c0_i32 = arith.constant 0 : i32
    %c0_i32_0 = arith.constant 0 : i32
    %c0_i32_1 = arith.constant 0 : i32
    return %arg0, %c0_i32, %c0_i32_0 : i32, i32, i32
  }
  func.func @transform_2(%arg0: i32) -> (i32, i32) {
    %c0_i32 = arith.constant 0 : i32
    %c0_i32_0 = arith.constant 0 : i32
    %c0_i32_1 = arith.constant 0 : i32
    return %c0_i32, %c0_i32_0 : i32, i32
  }
  func.func @transform_3(%arg0: i32) -> (i32, i32) {
    %c0_i32 = arith.constant 0 : i32
    %c0_i32_0 = arith.constant 0 : i32
    %c0_i32_1 = arith.constant 0 : i32
    return %c0_i32, %c0_i32_0 : i32, i32
  }
  func.func @transform_4(%arg0: i32) -> (i32, i32) {
    %c0_i32 = arith.constant 0 : i32
    %c0_i32_0 = arith.constant 0 : i32
    %c0_i32_1 = arith.constant 0 : i32
    return %c0_i32, %c0_i32_0 : i32, i32
  }
  func.func @transform_5(%arg0: i32) -> (i32, i32) {
    %c0_i32 = arith.constant 0 : i32
    %c0_i32_0 = arith.constant 0 : i32
    %c0_i32_1 = arith.constant 0 : i32
    return %c0_i32, %c0_i32_0 : i32, i32
  }
  func.func @transform_6(%arg0: i32) -> (i32, i32) {
    %c0_i32 = arith.constant 0 : i32
    %c0_i32_0 = arith.constant 0 : i32
    %c0_i32_1 = arith.constant 0 : i32
    return %c0_i32, %c0_i32_0 : i32, i32
  }
  func.func @transform_7(%arg0: i32) -> (i32, i32) {
    %c0_i32 = arith.constant 0 : i32
    %c0_i32_0 = arith.constant 0 : i32
    %c0_i32_1 = arith.constant 0 : i32
    return %c0_i32, %c0_i32_0 : i32, i32
  }
  func.func @transform_8(%arg0: i32) -> (i32, i32) {
    %c0_i32 = arith.constant 0 : i32
    %c0_i32_0 = arith.constant 0 : i32
    %c0_i32_1 = arith.constant 0 : i32
    return %c0_i32, %c0_i32_0 : i32, i32
  }
  func.func @transform_9(%arg0: i32) -> (i32, i32, i32) {
    %c0_i32 = arith.constant 0 : i32
    %c0_i32_0 = arith.constant 0 : i32
    %c0_i32_1 = arith.constant 0 : i32
    return %arg0, %c0_i32, %c0_i32_0 : i32, i32, i32
  }
}

</mosaic_0001>

<bundles_post_ra>
// kernel: upsample_block_forward.1
= control target key start
LH: loop header
LB: loop body
LE: loop exit
PB: predicated region body
PF: predicated region fallthrough
CT: control target
= control target key end

     0   :  { %s1725_s30 = smov 0   ;;  %s2175_s0 = inlined_call_operand.vmem [shape: f32[2,8,64], index: 0, kind: input, shape index: {}]   ;;  %s2176_s1 = inlined_call_operand.vmem [shape: f32[2,8,256], index: 1, kind: input, shape index: {}]   ;;  %s2177_s2 = inlined_call_operand.vmem [shape: f32[64,256], index: 2, kind: input, shape index: {}]   ;;  %s2178_s3 = inlined_call_operand.vmem [shape: f32[8,72], index: 3, kind: input, shape index: {}]   ;;  %s2179_s4 = inlined_call_operand.vmem [shape: f32[8,1], index: 4, kind: input, shape index: {}]   ;;  %s2180_s5 = inlined_call_operand.vmem [shape: f32[8,144], index: 5, kind: input, shape index: {}]   ;;  %s2181_s6 = inlined_call_operand.vmem [shape: f32[8,1], index: 6, kind: input, shape index: {}]   ;;  %s2182_s7 = inlined_call_operand.vmem [shape: f32[4,72], index: 7, kind: input, shape index: {}]   ;;  %s2183_s8 = inlined_call_operand.vmem [shape: f32[4,1], index: 8, kind: input, shape index: {}]   ;;  %s2184_s9 = inlined_call_operand.vmem [shape: f32[2,4,256], index: 9, kind: output, shape index: {}]  }
   0x1 LB: > { %s1256_s10 = sadd.s32 4294967295, %s1660_s30   ;;  %p1260_p0 = scmp.ge.s32.totalorder %s1660_s30, 1  ;;  %s1660_s30 = sphi %s1725_s30, %s19_s30  }
   0x2   : > { %p296_p1 = scmp.lt.s32.totalorder %s1660_s30, 3 }
   0x4   : > { %p297_p2 = pnand %p1260_p0, %p296_p1 }
   0x5   : > { %v385_v0 = vld [vmem:[%s2177_s2 + $0x8] sm:$0xff] (!%p297_p2)  ;;  %v387_v1 = vld [vmem:[%s2177_s2 + $0x18] sm:$0xff] (!%p297_p2)  ;;  %v384_v2 = vld [vmem:[%s2177_s2] sm:$0xff] (!%p297_p2)  ;;  %v1662_v7 = vmov (!%p297_p2), 0.0   ;;  %p336_p3 = scmp.lt.s32.totalorder (!%p297_p2), %s1256_s10, 1  ;;  %vm400_vm0 = vcmask (!%p297_p2), 523264   ;;  %v353_v39 = vlaneseq (!%p297_p2) }
   0x6   : > { %300 = sbr.rel (%p297_p2) target bundleno = 1714 (0x6b2), region = 56  ;;  %v1320_v3 = vpack.c.bf16 (!%p297_p2), %v387_v1, %v385_v0  ;;  %v386_v4 = vld [vmem:[%s2177_s2 + $0x10] sm:$0xff] (!%p297_p2)  ;;  %v389_v5 = vld [vmem:[%s2177_s2 + $0x28] sm:$0xff] (!%p297_p2)  ;;  %v391_v6 = vld [vmem:[%s2177_s2 + $0x38] sm:$0xff] (!%p297_p2)  ;;  %468 = vmatprep.mubr.f32.mxu0 (!%p297_p2), %v1662_v7  ;;  %673 = vmatprep.mubr.f32.mxu1 (!%p297_p2), %v1662_v7  ;;  %s1663_s28 = smov (!%p297_p2), 17   ;;  %vm2188_vm1 = vcmask (!%p297_p2), 138240  }
   0x7   : > { %v1322_v8 = vpack.c.bf16 (!%p297_p2), %v386_v4, %v384_v2  ;;  %v1324_v9 = vpack.c.bf16 (!%p297_p2), %v391_v6, %v389_v5  ;;  %v388_v10 = vld [vmem:[%s2177_s2 + $0x20] sm:$0xff] (!%p297_p2)  ;;  %v390_v11 = vld [vmem:[%s2177_s2 + $0x30] sm:$0xff] (!%p297_p2)  ;;  %v393_v12 = vld [vmem:[%s2177_s2 + $0x48] sm:$0xff] (!%p297_p2)  ;;  %s1664_s29 = smov (!%p297_p2), 127   ;;  %s1665_s11 = smov (!%p297_p2), 126   ;;  %v1672_v38 = vmov (!%p297_p2), 0  }
   0x8   : > { %1321 = vmatprep.subr.bf16.mxu0 (!%p297_p2), %v1320_v3  ;;  %v395_v13 = vld [vmem:[%s2177_s2 + $0x58] sm:$0xff] (!%p297_p2)  ;;  %v1326_v14 = vpack.c.bf16 (!%p297_p2), %v390_v11, %v388_v10  ;;  %v392_v16 = vld [vmem:[%s2177_s2 + $0x40] sm:$0xff] (!%p297_p2)  ;;  %v394_v17 = vld [vmem:[%s2177_s2 + $0x50] sm:$0xff] (!%p297_p2)  ;;  %s1666_s12 = smov (!%p297_p2), 112   ;;  %s1667_s13 = smov (!%p297_p2), 110   ;;  %1497 = vset.pattern.permute.xlu0 (!%p297_p2), %v1672_v38  ;;  %v354_v42 = vand.u32 (!%p297_p2), 127, %v353_v39 }
   0x9   : > { %1323 = vmatpush1.bf16.msra.mxu0 (!%p297_p2), %v1322_v8  ;;  %v1328_v15 = vpack.c.bf16 (!%p297_p2), %v395_v13, %v393_v12  ;;  %v397_v18 = vld [vmem:[%s2177_s2 + $0x68] sm:$0xff] (!%p297_p2)  ;;  %v399_v19 = vld [vmem:[%s2177_s2 + $0x78] sm:$0xff] (!%p297_p2)  ;;  %v1330_v20 = vpack.c.bf16 (!%p297_p2), %v394_v17, %v392_v16  ;;  %v396_v22 = vld [vmem:[%s2177_s2 + $0x60] sm:$0xff] (!%p297_p2)  ;;  %s1668_s14 = smov (!%p297_p2), 111   ;;  %s1669_s15 = smov (!%p297_p2), 96   ;;  %1618 = vset.pattern.permute.xlu1 (!%p297_p2), %v1672_v38  ;;  %vm572_vm3 = vcmask (!%p297_p2), 1039360  }
   0xa   : > { %1325 = vmatprep.subr.bf16.mxu0 (!%p297_p2), %v1324_v9  ;;  %v1332_v21 = vpack.c.bf16 (!%p297_p2), %v399_v19, %v397_v18  ;;  %v398_v23 = vld [vmem:[%s2177_s2 + $0x70] sm:$0xff] (!%p297_p2)  ;;  %s1670_s17 = smov (!%p297_p2), 94   ;;  %s1671_s18 = smov (!%p297_p2), 95   ;;  %v599_v37 = vld [vmem:[%s2179_s4] sm:$0xff] (!%p297_p2)  ;;  %v355_v45 = vadd.s32 (!%p297_p2), 128, %v354_v42  ;;  %v360_v49 = vand.u32 (!%p297_p2), 15, %v354_v42 }
   0xb   : > { %v1334_v24 = vpack.c.bf16 (!%p297_p2), %v398_v23, %v396_v22  ;;  %vm507_vm5 = vcmask (!%p297_p2), 1031168   ;;  %vm1673_vm6 = vmmov (!%p297_p2), 1   ;;  %vm520_vm8 = vcmask (!%p297_p2), 916480  }
   0xc   : > { %v367_v48 = vand.u32 (!%p297_p2), 15, %v355_v45  ;;  %vm1845_vm4 = vcmp.ge.s32.totalorder (!%p297_p2), %v360_v49, 1  ;;  %vm1871_vm11 = vcmp.le.s32.totalorder (!%p297_p2), %v360_v49, 14  ;;  %vm533_vm12 = vcmask (!%p297_p2), 900096   ;;  %v475_v45 = vld [vmem:[%s2178_s3] sm:$0xff] (!%p297_p2) }
   0xd   : > { %s2234_s10 = smov (!%p336_p3, %s1256_s10), 1  ;;  %1327 = vmatpush1.bf16.msra.mxu0 %v1326_v14  ;;  %vm1863_vm9 = vmpackc.low %vm1673_vm6, %vm1845_vm4  ;;  %vm2185_vm14 = vcmask 908288  }
   0xe   : > { %1329 = vmatprep.subr.bf16.mxu0 %v1328_v15  ;;  %s1261_s24 = sshll.u32 %s2234_s10, 3  ;;  %s1318_s16 = sshll.u32 %s2234_s10, 4  ;;  %vm1841_vm2 = vcmp.ge.s32.totalorder %v367_v48, 1  ;;  %vm1867_vm10 = vcmp.le.s32.totalorder %v367_v48, 14  ;;  %vm1895_vm15 = vmpackc.low %vm1845_vm4, %vm1871_vm11  ;;  %vm2186_vm4 = vcmask 777216  }
   0xf   : > { %s339_s27 = scalar_lea.vmem %s2175_s0, %s1261_s24  ;;  %s344_s21 = scalar_lea.vmem %s2176_s1, %s1318_s16  ;;  %vm1853_vm7 = vmpackc.low %vm1673_vm6, %vm1841_vm2 }
  0x10   : > { %v350_v25 = vld [vmem:[%s339_s27] sm:$0xff]  ;;  %v352_v35 = vld [vmem:[%s344_s21 + $0x8] sm:$0xff]  ;;  %vm1887_vm13 = vmpackc.low %vm1841_vm2, %vm1867_vm10  ;;  %vm2190_vm2 = vcmask 785408   ;;  %s1674_s27 = smov 33  }
  0x11   : > { %1331 = vmatpush1.bf16.msra.mxu0 %v1330_v20  ;;  %v351_v34 = vld [vmem:[%s344_s21] sm:$0xff] }
  0x12   : > { %1333 = vmatprep.subr.bf16.mxu0 %v1332_v21  ;;  %v1492_v36 = vpack.i.bf16 %v352_v35, %v351_v34 }
  0x15   : > { %1335 = vmatpush1.bf16.msra.mxu0 %v1334_v24 }
  0x18   : > { %1266 = vmatmul.mubr.msk.f32.vlgmr.msra.gmra.mrb[0].mxu0 %vm400_vm0, %v350_v25  ;;  %vm1910_vm0 = vmpackc.low %vm1867_vm10, %vm1673_vm6 }
  0xeb   : > { %v470_v26 = vpop.f32.mrb[0].mxu0 }
  0xec   : > { %478 = vrot.lane.b32.xlu0 %v470_v26, %s1663_s28  ;;  %v472_v27 = vpop.f32.mrb[1].mxu0 }
  0xf0   : > { %480 = vrot.lane.b32.xlu0 %v472_v27, %s1663_s28 }
 0x15e   : > { %v479_v28 = vpop.permute.xlu0 %478 }
 0x15f   : > { %v1798_v29 = vsel %vm2188_vm1, 0.0, %v479_v28 }
 0x160   : > { %566 = vrot.lane.b32.xlu1 %v1798_v29, %s1664_s29  ;;  %501 = vrot.lane.b32.xlu0 %v1798_v29, %s1665_s11 }
 0x162   : > { %v481_v30 = vpop.permute.xlu0 %480 }
 0x163   : > { %v1809_v31 = vsel %vm2188_vm1, %v479_v28, %v481_v30  ;;  %v488_v32 = vsel %vm2188_vm1, %v481_v30, 0.0 }
 0x164   : > { %514 = vrot.lane.b32.xlu1 %v1798_v29, %s1666_s12  ;;  %527 = vrot.lane.b32.xlu0 %v1798_v29, %s1667_s13  ;;  %v1462_v33 = vpack.i.bf16 %v488_v32, %v1809_v31 }
 0x168   : > { %577 = vrot.lane.b32.xlu1 %v1798_v29, %s1668_s14  ;;  %540 = vrot.lane.b32.xlu0 %v1798_v29, %s1669_s15 }
 0x16c   : > { %1463 = vrot.lane.b32.xlu0 %v1462_v33, %s1665_s11  ;;  %1458 = vrot.lane.b32.xlu1 %v1462_v33, %s1664_s29 }
 0x170   : > { %1473 = vrot.lane.b32.xlu0 %v1462_v33, %s1667_s13  ;;  %1468 = vrot.lane.b32.xlu1 %v1462_v33, %s1666_s12 }
 0x174   : > { %1483 = vrot.lane.b32.xlu0 %v1462_v33, %s1669_s15  ;;  %1478 = vrot.lane.b32.xlu1 %v1462_v33, %s1668_s14 }
 0x178   : > { %555 = vrot.lane.b32.xlu0 %v1809_v31, %s1670_s17  ;;  %1488 = vrot.lane.b32.xlu1 %v1462_v33, %s1671_s18 }
 0x17c   : > { %553 = vrot.lane.b32.xlu0 %v1798_v29, %s1670_s17  ;;  %588 = vrot.lane.b32.xlu1 %v1798_v29, %s1671_s18 }
 0x180   : > { %557 = vrot.lane.b32.xlu1 %v488_v32, %s1670_s17  ;;  %602 = vperm.xlu0 %1497, %v599_v37  }
 0x184   : > { %1493 = vrot.lane.b32.xlu1 %v1492_v36, %s1663_s28 }
 0x1d2   : > { %v567_v40 = vpop.permute.xlu1 %566  ;;  %v502_v41 = vpop.permute.xlu0 %501 }
 0x1d6   : > { %v515_v43 = vpop.permute.xlu1 %514  ;;  %v528_v44 = vpop.permute.xlu0 %527 }
 0x1da   : > { %v578_v46 = vpop.permute.xlu1 %577  ;;  %v1839_v47 = vpop.permute.xlu0 %540 }
 0x1de   : > { %v1459_v50 = vpop.permute.xlu1 %1458  ;;  %v1464_v51 = vpop.permute.xlu0 %1463 }
 0x1df   : > { %v1461_v53 = vunpack.i.h.bf16 %v1459_v50  ;;  %v1460_v54 = vunpack.i.l.bf16 %v1459_v50  ;;  %v1466_v56 = vunpack.i.h.bf16 %v1464_v51  ;;  %v1465_v57 = vunpack.i.l.bf16 %v1464_v51 }
 0x1e1   : > { %v574_v58 = vsel %vm572_vm3, %v1460_v54, %v1461_v53  ;;  %v573_v60 = vsel %vm572_vm3, %v567_v40, %v1460_v54  ;;  %v508_v9 = vsel %vm507_vm5, %v502_v41, %v1465_v57  ;;  %v509_v10 = vsel %vm507_vm5, %v1465_v57, %v1466_v56 }
 0x1e2   : > { %v1469_v61 = vpop.permute.xlu1 %1468  ;;  %v1474_v62 = vpop.permute.xlu0 %1473  ;;  %v1336_v63 = vpack.c.bf16 %v574_v58, %v1809_v31  ;;  %v1339_v0 = vpack.c.bf16 %v573_v60, %v1798_v29 }
 0x1e3   : > { %v1471_v3 = vunpack.i.h.bf16 %v1469_v61  ;;  %v1470_v4 = vunpack.i.l.bf16 %v1469_v61  ;;  %v1476_v6 = vunpack.i.h.bf16 %v1474_v62  ;;  %v1475_v8 = vunpack.i.l.bf16 %v1474_v62 }
 0x1e4   : > { %1338 = vmatprep.subr.msk.bf16.mxu1 %vm1853_vm7, %v1336_v63 }
 0x1e5   : > { %v521_v11 = vsel %vm520_vm8, %v515_v43, %v1470_v4  ;;  %v522_v12 = vsel %vm520_vm8, %v1470_v4, %v1471_v3  ;;  %1341 = vmatpush1.bf16.msk.msra.mxu1 %vm1863_vm9, %v1339_v0  ;;  %v534_v21 = vsel %vm533_vm12, %v528_v44, %v1475_v8  ;;  %v535_v22 = vsel %vm533_vm12, %v1475_v8, %v1476_v6 }
 0x1e6   : > { %v1342_v14 = vpack.c.bf16 %v522_v12, %v509_v10  ;;  %v1345_v15 = vpack.c.bf16 %v521_v11, %v508_v9  ;;  %v1479_v16 = vpop.permute.xlu1 %1478  ;;  %v1484_v17 = vpop.permute.xlu0 %1483 }
 0x1e7   : > { %v1481_v19 = vunpack.i.h.bf16 %v1479_v16  ;;  %v1480_v20 = vunpack.i.l.bf16 %v1479_v16  ;;  %v1486_v25 = vunpack.i.h.bf16 %v1484_v17  ;;  %v1485_v26 = vunpack.i.l.bf16 %v1484_v17 }
 0x1e8   : > { %1344 = vmatprep.subr.msk.bf16.mxu1 %vm1887_vm13, %v1342_v14 }
 0x1e9   : > { %v584_v23 = vsel %vm2185_vm14, %v578_v46, %v1480_v20  ;;  %v585_v24 = vsel %vm2185_vm14, %v1480_v20, %v1481_v19  ;;  %1347 = vmatpush1.bf16.msk.msra.mxu1 %vm1895_vm15, %v1345_v15  ;;  %vm1917_vm14 = vmpackc.low %vm1871_vm11, %vm1673_vm6  ;;  %v548_v35 = vsel %vm2190_vm2, %v1485_v26, %v1486_v25  ;;  %v547_v39 = vsel %vm2190_vm2, %v1839_v47, %v1485_v26 }
 0x1ea   : > { %v1348_v28 = vpack.c.bf16 %v535_v22, %v585_v24  ;;  %v1351_v29 = vpack.c.bf16 %v534_v21, %v584_v23  ;;  %v1489_v30 = vpop.permute.xlu1 %1488  ;;  %v556_v34 = vpop.permute.xlu0 %555  ;;  %vm2189_vm6 = vcmask 769024   ;;  %v911_v24 = vld [vmem:[%s2180_s5 + $0x8] sm:$0xff] }
 0x1eb   : > { %v1491_v32 = vunpack.i.h.bf16 %v1489_v30  ;;  %v1490_v33 = vunpack.i.l.bf16 %v1489_v30 }
 0x1ec   : > { %1350 = vmatprep.subr.msk.bf16.mxu1 %vm1910_vm0, %v1348_v28 }
 0x1ed   : > { %v596_v36 = vsel %vm2186_vm4, %v1490_v33, %v1491_v32  ;;  %1353 = vmatpush1.bf16.msk.msra.mxu1 %vm1917_vm14, %v1351_v29  ;;  %v912_v29 = vld [vmem:[%s2181_s6] sm:$0xff] }
 0x1ee   : > { %v1354_v37 = vpack.c.bf16 %v596_v36, %v548_v35  ;;  %v589_v38 = vpop.permute.xlu1 %588  ;;  %v554_v42 = vpop.permute.xlu0 %553 }
 0x1ef   : > { %v595_v40 = vsel %vm2186_vm4, %v589_v38, %v1490_v33  ;;  %vm2187_vm4 = vcmask 588800   ;;  %v560_v46 = vsel %vm2189_vm6, %v554_v42, %v556_v34 }
 0x1f0   : > { %v1357_v41 = vpack.c.bf16 %v595_v40, %v547_v39  ;;  %1356 = vmatprep.subr.msk.bf16.mxu1 %vm1853_vm7, %v1354_v37 }
 0x1f2   : > { %v558_v43 = vpop.permute.xlu1 %557  ;;  %1359 = vmatpush1.bf16.msk.msra.mxu1 %vm1863_vm9, %v1357_v41 }
 0x1f3   : > { %v561_v44 = vsel %vm2189_vm6, %v556_v34, %v558_v43 }
 0x1f4   : > { %1277 = vmatprep.subr.msk.mxu1 %vm1867_vm10, %v561_v44 }
 0x1f6   : > { %v1494_v47 = vpop.permute.xlu1 %1493  ;;  %1278 = vmatpush1.msk.msra.mxu1 %vm1871_vm11, %v560_v46 }
 0x1f7   : > { %v1496_v48 = vunpack.i.h.bf16 %v1494_v47  ;;  %v1495_v49 = vunpack.i.l.bf16 %v1494_v47  ;;  %1279 = vmatmul.mubr.msk.f32.vlgmr.msra.gmra.mrb[0].mxu1 %vm2187_vm4, %v475_v45  ;;  %vm888_vm4 = vcmask 269312  }
 0x1f8   : > { %1175 = vmatprep.mubr.f32.mxu1 %v1662_v7 }
 0x1f9   : > { %v1946_v50 = vsel %vm2188_vm1, %v1495_v49, %v1496_v48  ;;  %v1949_v51 = vsel %vm2188_vm1, 0.0, %v1495_v49  ;;  %v767_v53 = vsel %vm2188_vm1, %v1496_v48, 0.0 }
 0x1fa   : > { %v1498_v52 = vpack.i.bf16 %v1946_v50, %v1949_v51  ;;  %v1513_v9 = vpack.i.bf16 %v1949_v51, %v767_v53  ;;  %v1593_v20 = vpack.i.bf16 %v767_v53, %v1946_v50 }
 0x1fc   : > { %1499 = vrot.lane.b32.xlu1 %v1498_v52, %s1670_s17 }
 0x1ff   : > { %v603_v63 = vpop.permute.xlu0 %602 }
 0x200   : > { %824 = vrot.lane.b32.xlu1 %v767_v53, %s1670_s17 }
 0x26e   : > { %v1500_v54 = vpop.permute.xlu1 %1499 }
 0x26f   : > { %v1502_v55 = vunpack.i.h.bf16 %v1500_v54  ;;  %v1501_v56 = vunpack.i.l.bf16 %v1500_v54 }
 0x271   : > { %v826_v7 = vsel %vm2189_vm6, %v1501_v56, %v1502_v55 }
 0x272   : > { %v825_v57 = vpop.permute.xlu1 %824  ;;  %v830_v58 = vsel %vm1871_vm11, %v826_v7, 0.0 }
 0x273   : > { %v827_v60 = vsel %vm2189_vm6, %v1502_v55, %v825_v57 }
 0x274   : > { %v831_v61 = vsel %vm1867_vm10, %v827_v60, 0.0 }
 0x275   : > { %v1508_v62 = vpack.i.bf16 %v831_v61, %v830_v58 }
 0x277   : > { %1509 = vrot.lane.b32.xlu1 %v1508_v62, %s1674_s27 }
 0x2ca   : > { %v675_v0 = vpop.f32.mrb[0].mxu1 }
 0x2cb   : > { %v676_v3 = vadd.f32 %v675_v0, %v603_v63  ;;  %v677_v4 = vpop.f32.mrb[1].mxu1 }
 0x2cc   : > { %v678_v6 = vadd.f32 %v677_v4, %v603_v63 }
 0x2ce   : > { %v1503_v8 = vpack.i.bf16 %v678_v6, %v676_v3 }
 0x2d0   : > { %1504 = vrot.lane.b32.xlu0 %v1503_v8, %s1663_s28 }
 0x2d4   : > { %1514 = vrot.lane.b32.xlu0 %v1513_v9, %s1665_s11 }
 0x2e9   : > { %v1510_v21 = vpop.permute.xlu1 %1509 }
 0x2ea   : > { %v1512_v22 = vunpack.i.h.bf16 %v1510_v21  ;;  %v1511_v23 = vunpack.i.l.bf16 %v1510_v21 }
 0x2ec   : > { %v889_v25 = vsel %vm888_vm4, %v1511_v23, %v1512_v22  ;;  %v1613_v28 = vpack.i.bf16 %v1511_v23, %v1949_v51 }
 0x2ed   : > { %v1608_v26 = vpack.i.bf16 %v1512_v22, %v889_v25 }
 0x342   : > { %v1505_v10 = vpop.permute.xlu0 %1504 }
 0x343   : > { %v1506_v11 = vunpack.i.l.bf16 %v1505_v10  ;;  %v1507_v15 = vunpack.i.h.bf16 %v1505_v10 }
 0x345   : > { %v1966_v12 = vsel %vm2188_vm1, 0.0, %v1506_v11  ;;  %v691_v16 = vsel %vm2188_vm1, %v1507_v15, 0.0  ;;  %v686_v17 = vsel %vm2188_vm1, %v1506_v11, %v1507_v15  ;;  %vm918_vm1 = vcmask 130048  }
 0x346   : > { %v1523_v14 = vpack.i.bf16 %v1946_v50, %v1966_v12  ;;  %v1538_v19 = vpack.i.bf16 %v691_v16, %v686_v17  ;;  %1302 = vmatprep.mubr.msk.f32.mxu0 %vm918_vm1, %v911_v24  ;;  %v2012_v30 = vpop.permute.xlu0 %1514  ;;  %vm2211_vm1 = vcmask 908288  }
 0x347   : > { %vm2212_vm4 = vmmov %vm2211_vm1 }
 0x348   : > { %1524 = vrot.lane.b32.xlu0 %v1523_v14, %s1665_s11  ;;  %1519 = vrot.lane.b32.xlu1 %v1523_v14, %s1664_s29 }
 0x34c   : > { %720 = vrot.lane.b32.xlu0 %v1966_v12, %s1667_s13  ;;  %1529 = vrot.lane.b32.xlu1 %v1523_v14, %s1666_s12 }
 0x350   : > { %732 = vrot.lane.b32.xlu0 %v1966_v12, %s1669_s15  ;;  %1534 = vrot.lane.b32.xlu1 %v1523_v14, %s1668_s14 }
 0x354   : > { %852 = vrot.lane.b32.xlu1 %v1966_v12, %s1671_s18  ;;  %1539 = vrot.lane.b32.xlu0 %v1538_v19, %s1664_s29 }
 0x358   : > { %744 = vrot.lane.b32.xlu1 %v1966_v12, %s1670_s17  ;;  %1544 = vrot.lane.b32.xlu0 %v1538_v19, %s1665_s11 }
 0x35c   : > { %1549 = vrot.lane.b32.xlu1 %v1538_v19, %s1666_s12  ;;  %1554 = vrot.lane.b32.xlu0 %v1538_v19, %s1667_s13 }
 0x360   : > { %1559 = vrot.lane.b32.xlu1 %v1538_v19, %s1668_s14  ;;  %1564 = vrot.lane.b32.xlu0 %v1538_v19, %s1669_s15 }
 0x364   : > { %1569 = vrot.lane.b32.xlu1 %v1538_v19, %s1671_s18  ;;  %1579 = vrot.lane.b32.xlu0 %v1538_v19, %s1670_s17 }
 0x368   : > { %1574 = vrot.lane.b32.xlu1 %v1513_v9, %s1664_s29  ;;  %1584 = vrot.lane.b32.xlu0 %v1513_v9, %s1666_s12 }
 0x36c   : > { %1589 = vrot.lane.b32.xlu1 %v1513_v9, %s1668_s14  ;;  %1594 = vrot.lane.b32.xlu0 %v1593_v20, %s1667_s13 }
 0x370   : > { %1599 = vrot.lane.b32.xlu1 %v1593_v20, %s1669_s15  ;;  %796 = vrot.lane.b32.xlu0 %v1949_v51, %s1667_s13 }
 0x374   : > { %808 = vrot.lane.b32.xlu1 %v1949_v51, %s1669_s15  ;;  %1604 = vrot.lane.b32.xlu0 %v1593_v20, %s1671_s18 }
 0x378   : > { %1609 = vrot.lane.b32.xlu1 %v1608_v26, %s1671_s18  ;;  %1614 = vrot.lane.b32.xlu0 %v1613_v28, %s1671_s18 }
 0x37c   : > { %915 = vperm.xlu1 %1618, %v912_v29  }
 0x3ba   : > { %v2014_v32 = vpop.permute.xlu0 %1524  ;;  %v2016_v33 = vpop.permute.xlu1 %1519 }
 0x3bb   : > { %v1521_v40 = vunpack.i.l.bf16 %v2016_v33  ;;  %v1526_v53 = vunpack.i.l.bf16 %v2014_v32 }
 0x3be   : > { %v721_v34 = vpop.permute.xlu0 %720  ;;  %v2018_v35 = vpop.permute.xlu1 %1529 }
 0x3bf   : > { %v1531_v56 = vunpack.i.l.bf16 %v2018_v35 }
 0x3c2   : > { %v733_v36 = vpop.permute.xlu0 %732  ;;  %v2020_v37 = vpop.permute.xlu1 %1534 }
 0x3c3   : > { %v1536_v9 = vunpack.i.l.bf16 %v2020_v37 }
 0x3c6   : > { %v853_v38 = vpop.permute.xlu1 %852  ;;  %v1540_v39 = vpop.permute.xlu0 %1539 }
 0x3c7   : > { %v1542_v41 = vunpack.i.h.bf16 %v1540_v39  ;;  %v1541_v42 = vunpack.i.l.bf16 %v1540_v39 }
 0x3c9   : > { %v838_v43 = vsel %vm572_vm3, %v1521_v40, %v1541_v42  ;;  %v839_v44 = vsel %vm572_vm3, %v1541_v42, %v1542_v41  ;;  %v1527_v42 = vunpack.i.h.bf16 %v2014_v32  ;;  %v1517_v32 = vunpack.i.h.bf16 %v2012_v30 }
 0x3ca   : > { %v1360_v45 = vpack.c.bf16 %v839_v44, %v686_v17  ;;  %v1363_v46 = vpack.c.bf16 %v838_v43, %v1966_v12  ;;  %v745_v47 = vpop.permute.xlu1 %744  ;;  %v1545_v48 = vpop.permute.xlu0 %1544 }
 0x3cb   : > { %v1546_v49 = vunpack.i.l.bf16 %v1545_v48  ;;  %v1547_v52 = vunpack.i.h.bf16 %v1545_v48 }
 0x3cc   : > { %1362 = vmatprep.subr.msk.bf16.mxu0 %vm1853_vm7, %v1360_v45 }
 0x3cd   : > { %1365 = vmatpush1.bf16.msk.msra.mxu0 %vm1863_vm9, %v1363_v46  ;;  %v702_v58 = vsel %vm507_vm5, %v1526_v53, %v1546_v49  ;;  %v703_v61 = vsel %vm507_vm5, %v1546_v49, %v1547_v52  ;;  %v1522_v46 = vunpack.i.h.bf16 %v2016_v33  ;;  %v1516_v52 = vunpack.i.l.bf16 %v2012_v30 }
 0x3ce   : > { %v1550_v54 = vpop.permute.xlu1 %1549  ;;  %v1555_v55 = vpop.permute.xlu0 %1554  ;;  %v778_v30 = vsel %vm507_vm5, %v1517_v32, %v1527_v42 }
 0x3cf   : > { %v1552_v7 = vunpack.i.h.bf16 %v1550_v54  ;;  %v1551_v57 = vunpack.i.l.bf16 %v1550_v54  ;;  %v1556_v60 = vunpack.i.l.bf16 %v1555_v55  ;;  %v1557_v0 = vunpack.i.h.bf16 %v1555_v55 }
 0x3d0   : > { %v779_v33 = vsel %vm507_vm5, %v1527_v42, %v1516_v52 }
 0x3d1   : > { %v714_v62 = vsel %vm520_vm8, %v1531_v56, %v1551_v57  ;;  %v715_v63 = vsel %vm520_vm8, %v1551_v57, %v1552_v7  ;;  %v726_v12 = vsel %vm533_vm12, %v721_v34, %v1556_v60  ;;  %v727_v15 = vsel %vm533_vm12, %v1556_v60, %v1557_v0 }
 0x3d2   : > { %v1366_v3 = vpack.c.bf16 %v715_v63, %v703_v61  ;;  %v1369_v4 = vpack.c.bf16 %v714_v62, %v702_v58  ;;  %v1560_v6 = vpop.permute.xlu1 %1559  ;;  %v1565_v8 = vpop.permute.xlu0 %1564  ;;  %v1532_v60 = vunpack.i.h.bf16 %v2018_v35 }
 0x3d3   : > { %v1562_v10 = vunpack.i.h.bf16 %v1560_v6  ;;  %v1561_v11 = vunpack.i.l.bf16 %v1560_v6  ;;  %v1566_v14 = vunpack.i.l.bf16 %v1565_v8  ;;  %v1567_v19 = vunpack.i.h.bf16 %v1565_v8 }
 0x3d4   : > { %1368 = vmatprep.subr.msk.bf16.mxu0 %vm1887_vm13, %v1366_v3 }
 0x3d5   : > { %v848_v16 = vsel %vm2211_vm1, %v1536_v9, %v1561_v11  ;;  %v849_v17 = vsel %vm2212_vm4, %v1561_v11, %v1562_v10  ;;  %1371 = vmatpush1.bf16.msk.msra.mxu0 %vm1895_vm15, %v1369_v4  ;;  %v738_v29 = vsel %vm2190_vm2, %v733_v36, %v1566_v14  ;;  %v739_v34 = vsel %vm2190_vm2, %v1566_v14, %v1567_v19 }
 0x3d6   : > { %v1372_v20 = vpack.c.bf16 %v727_v15, %v849_v17  ;;  %v1375_v21 = vpack.c.bf16 %v726_v12, %v848_v16  ;;  %v1570_v22 = vpop.permute.xlu1 %1569  ;;  %v1580_v23 = vpop.permute.xlu0 %1579  ;;  %vm2213_vm1 = vcmask 777216  }
 0x3d7   : > { %v1572_v24 = vunpack.i.h.bf16 %v1570_v22  ;;  %v1571_v25 = vunpack.i.l.bf16 %v1570_v22  ;;  %v1582_v26 = vunpack.i.h.bf16 %v1580_v23  ;;  %v1581_v28 = vunpack.i.l.bf16 %v1580_v23  ;;  %vm2214_vm4 = vmmov %vm2213_vm1 }
 0x3d8   : > { %1374 = vmatprep.subr.msk.bf16.mxu0 %vm1910_vm0, %v1372_v20 }
 0x3d9   : > { %v858_v39 = vsel %vm2213_vm1, %v853_v38, %v1571_v25  ;;  %v859_v40 = vsel %vm2214_vm4, %v1571_v25, %v1572_v24  ;;  %v751_v41 = vsel %vm2189_vm6, %v1581_v28, %v1582_v26  ;;  %1377 = vmatpush1.bf16.msk.msra.mxu0 %vm1917_vm14, %v1375_v21  ;;  %v750_v38 = vsel %vm2189_vm6, %v745_v47, %v1581_v28 }
 0x3da   : > { %v1378_v43 = vpack.c.bf16 %v859_v40, %v739_v34  ;;  %v1381_v44 = vpack.c.bf16 %v858_v39, %v738_v29  ;;  %v1575_v45 = vpop.permute.xlu1 %1574  ;;  %v1585_v36 = vpop.permute.xlu0 %1584  ;;  %v1384_v53 = vpack.c.bf16 %v1946_v50, %v751_v41  ;;  %v1537_v50 = vunpack.i.h.bf16 %v2020_v37 }
 0x3db   : > { %v1577_v48 = vunpack.i.h.bf16 %v1575_v45  ;;  %v1576_v49 = vunpack.i.l.bf16 %v1575_v45  ;;  %v1586_v55 = vunpack.i.l.bf16 %v1585_v36  ;;  %v1387_v47 = vpack.c.bf16 %v1949_v51, %v750_v38 }
 0x3dc   : > { %1380 = vmatprep.subr.msk.bf16.mxu0 %vm1853_vm7, %v1378_v43  ;;  %vm2215_vm1 = vcmask 908288   ;;  %v1587_v3 = vunpack.i.h.bf16 %v1585_v36 }
 0x3dd   : > { %v869_v54 = vsel %vm572_vm3, %v1522_v46, %v1576_v49  ;;  %1383 = vmatpush1.bf16.msk.msra.mxu0 %vm1863_vm9, %v1381_v44  ;;  %v868_v57 = vsel %vm572_vm3, %v1577_v48, %v1522_v46  ;;  %v791_v37 = vsel %vm520_vm8, %v1532_v60, %v1586_v55  ;;  %vm2216_vm4 = vmmov %vm2215_vm1  ;;  %v910_v46 = vld [vmem:[%s2180_s5] sm:$0xff] }
 0x3de   : > { %v1590_v56 = vpop.permute.xlu1 %1589  ;;  %v1595_v7 = vpop.permute.xlu0 %1594  ;;  %1386 = vmatprep.subr.msk.bf16.mxu0 %vm1887_vm13, %v1384_v53  ;;  %v1390_v61 = vpack.c.bf16 %v779_v33, %v869_v54  ;;  %v1393_v0 = vpack.c.bf16 %v778_v30, %v868_v57  ;;  %v790_v14 = vsel %vm520_vm8, %v1587_v3, %v1532_v60  ;;  %v1102_v57 = vld [vmem:[%s2183_s8] sm:$0xf] }
 0x3df   : > { %v1591_v58 = vunpack.i.l.bf16 %v1590_v56  ;;  %v1592_v62 = vunpack.i.h.bf16 %v1590_v56  ;;  %v1597_v6 = vunpack.i.h.bf16 %v1595_v7  ;;  %v1596_v35 = vunpack.i.l.bf16 %v1595_v7 }
 0x3e1   : > { %v879_v63 = vsel %vm2215_vm1, %v1537_v50, %v1591_v58  ;;  %1389 = vmatpush1.bf16.msk.msra.mxu0 %vm1895_vm15, %v1387_v47  ;;  %v878_v10 = vsel %vm2216_vm4, %v1592_v62, %v1537_v50  ;;  %v803_v19 = vsel %vm533_vm12, %v1596_v35, %v1597_v6  ;;  %vm2217_vm1 = vcmask 777216  }
 0x3e2   : > { %v1600_v4 = vpop.permute.xlu1 %1599  ;;  %v797_v51 = vpop.permute.xlu0 %796  ;;  %1392 = vmatprep.subr.msk.bf16.mxu0 %vm1910_vm0, %v1390_v61  ;;  %v1396_v11 = vpack.c.bf16 %v879_v63, %v791_v37  ;;  %v1399_v17 = vpack.c.bf16 %v878_v10, %v790_v14  ;;  %vm2218_vm4 = vmmov %vm2217_vm1 }
 0x3e3   : > { %v1602_v8 = vunpack.i.h.bf16 %v1600_v4  ;;  %v1601_v9 = vunpack.i.l.bf16 %v1600_v4  ;;  %v802_v22 = vsel %vm533_vm12, %v797_v51, %v1596_v35  ;;  %vm2219_vm6 = vmmov %vm2217_vm1 }
 0x3e5   : > { %v815_v12 = vsel %vm2190_vm2, %v1601_v9, %v1602_v8  ;;  %1395 = vmatpush1.bf16.msk.msra.mxu0 %vm1917_vm14, %v1393_v0 }
 0x3e6   : > { %v809_v15 = vpop.permute.xlu1 %808  ;;  %v1605_v16 = vpop.permute.xlu0 %1604  ;;  %1398 = vmatprep.subr.msk.bf16.mxu0 %vm1853_vm7, %v1396_v11  ;;  %v1402_v21 = vpack.c.bf16 %v815_v12, %v803_v19 }
 0x3e7   : > { %v814_v20 = vsel %vm2190_vm2, %v809_v15, %v1601_v9  ;;  %v1607_v23 = vunpack.i.h.bf16 %v1605_v16  ;;  %v1606_v24 = vunpack.i.l.bf16 %v1605_v16  ;;  %vm2220_vm2 = vmmov %vm2217_vm1 }
 0x3e8   : > { %v1405_v25 = vpack.c.bf16 %v814_v20, %v802_v22 }
 0x3e9   : > { %1401 = vmatpush1.bf16.msk.msra.mxu0 %vm1863_vm9, %v1399_v17  ;;  %v903_v43 = vsel %vm2219_vm6, %v1606_v24, %v1607_v23 }
 0x3ea   : > { %v1610_v26 = vpop.permute.xlu1 %1609  ;;  %v1615_v28 = vpop.permute.xlu0 %1614  ;;  %1404 = vmatprep.subr.msk.bf16.mxu0 %vm1887_vm13, %v1402_v21 }
 0x3eb   : > { %v1612_v29 = vunpack.i.h.bf16 %v1610_v26  ;;  %v1611_v34 = vunpack.i.l.bf16 %v1610_v26  ;;  %v1617_v39 = vunpack.i.h.bf16 %v1615_v28  ;;  %v1616_v40 = vunpack.i.l.bf16 %v1615_v28 }
 0x3ed   : > { %v904_v41 = vsel %vm2217_vm1, %v1617_v39, %v1611_v34  ;;  %v902_v42 = vsel %vm2218_vm4, %v1616_v40, %v1606_v24  ;;  %1407 = vmatpush1.bf16.msk.msra.mxu0 %vm1895_vm15, %v1405_v25  ;;  %v905_v44 = vsel %vm2220_vm2, %v1611_v34, %v1612_v29  ;;  %vm2221_vm2 = vcmask 138240  }
 0x3ee   : > { %v1410_v45 = vpack.c.bf16 %v904_v41, %v902_v42  ;;  %v1408_v36 = vpack.c.bf16 %v905_v44, %v903_v43  ;;  %vm2222_vm6 = vmmov %vm2221_vm2 }
 0x3ef   : > { %vm2223_vm1 = vmmov %vm2221_vm2 }
 0x3f0   : > { %1409 = vmatprep.subr.bf16.mxu0 %v1408_v36 }
 0x3f1   : > { %1411 = vmatpush1.bf16.msra.mxu0 %v1410_v45 }
 0x3f4   : > { %987 = vmatmul.mubr.f32.vlgmr.msra.gmra.mrb[2].mxu0 %v910_v46 }
 0x3fb   : > { %v916_v48 = vpop.permute.xlu1 %915 }
 0x4c7   : > { %v988_v49 = vpop.f32.mrb[2].mxu0 }
 0x4c8   : > { %v989_v52 = vadd.f32 %v988_v49, %v916_v48  ;;  %v990_v38 = vpop.f32.mrb[3].mxu0 }
 0x4c9   : > { %v991_v53 = vadd.f32 %v990_v38, %v916_v48 }
 0x4ca   : > { %v993_v54 = vmax.f32 %v989_v52, 0.0 }
 0x4cb   : > { %v994_v32 = vmax.f32 %v991_v53, 0.0 }
 0x4cc   : > { %998 = vrot.lane.b32.xlu0 %v993_v54, %s1663_s28 }
 0x4cd   : > { %1000 = vrot.lane.b32.xlu1 %v994_v32, %s1663_s28 }
 0x53e   : > { %v999_v33 = vpop.permute.xlu0 %998 }
 0x53f   : > { %v1006_v55 = vsel %vm2221_vm2, 0.0, %v999_v33  ;;  %v1001_v56 = vpop.permute.xlu1 %1000 }
 0x540   : > { %1012 = vrot.lane.b32.xlu0 %v1006_v55, %s1665_s11  ;;  %1072 = vrot.lane.b32.xlu1 %v1006_v55, %s1664_s29  ;;  %v1002_v7 = vsel %vm2222_vm6, %v999_v33, %v1001_v56  ;;  %v1007_v50 = vsel %vm2223_vm1, %v1001_v56, 0.0  ;;  %v995_v56 = vld [vmem:[%s2182_s7] sm:$0xf] }
 0x541   : > { %v1629_v47 = vpack.i.bf16 %v1007_v50, %v1002_v7 }
 0x544   : > { %1036 = vrot.lane.b32.xlu0 %v1006_v55, %s1667_s13  ;;  %1024 = vrot.lane.b32.xlu1 %v1006_v55, %s1666_s12 }
 0x548   : > { %1048 = vrot.lane.b32.xlu0 %v1006_v55, %s1669_s15  ;;  %1082 = vrot.lane.b32.xlu1 %v1006_v55, %s1668_s14 }
 0x54c   : > { %1630 = vrot.lane.b32.xlu1 %v1629_v47, %s1666_s12  ;;  %1620 = vrot.lane.b32.xlu0 %v1629_v47, %s1664_s29 }
 0x550   : > { %1640 = vrot.lane.b32.xlu1 %v1629_v47, %s1668_s14  ;;  %1625 = vrot.lane.b32.xlu0 %v1629_v47, %s1665_s11 }
 0x554   : > { %1650 = vrot.lane.b32.xlu1 %v1629_v47, %s1671_s18  ;;  %1635 = vrot.lane.b32.xlu0 %v1629_v47, %s1667_s13 }
 0x558   : > { %1092 = vrot.lane.b32.xlu1 %v1006_v55, %s1671_s18  ;;  %1645 = vrot.lane.b32.xlu0 %v1629_v47, %s1669_s15  ;;  %s349_s15 = scalar_lea.vmem %s2184_s9, %s1261_s24 }
 0x55c   : > { %1064 = vrot.lane.b32.xlu1 %v1007_v50, %s1670_s17  ;;  %1062 = vrot.lane.b32.xlu0 %v1002_v7, %s1670_s17 }
 0x560   : > { %1105 = vperm.xlu1 %1618, %v1102_v57   ;;  %1060 = vrot.lane.b32.xlu0 %v1006_v55, %s1670_s17 }
 0x5b2   : > { %v1013_v58 = vpop.permute.xlu0 %1012  ;;  %v1073_v60 = vpop.permute.xlu1 %1072 }
 0x5b6   : > { %v1037_v61 = vpop.permute.xlu0 %1036  ;;  %v1025_v62 = vpop.permute.xlu1 %1024 }
 0x5ba   : > { %v1049_v30 = vpop.permute.xlu0 %1048  ;;  %v1083_v63 = vpop.permute.xlu1 %1082 }
 0x5be   : > { %v1631_v0 = vpop.permute.xlu1 %1630  ;;  %v1621_v3 = vpop.permute.xlu0 %1620 }
 0x5bf   : > { %v1623_v37 = vunpack.i.h.bf16 %v1621_v3  ;;  %v1622_v4 = vunpack.i.l.bf16 %v1621_v3  ;;  %v1633_v51 = vunpack.i.h.bf16 %v1631_v0  ;;  %v1632_v6 = vunpack.i.l.bf16 %v1631_v0 }
 0x5c1   : > { %v1078_v35 = vsel %vm572_vm3, %v1073_v60, %v1622_v4  ;;  %v1079_v8 = vsel %vm572_vm3, %v1622_v4, %v1623_v37  ;;  %v1030_v19 = vsel %vm520_vm8, %v1025_v62, %v1632_v6  ;;  %v1031_v20 = vsel %vm520_vm8, %v1632_v6, %v1633_v51 }
 0x5c2   : > { %v1412_v9 = vpack.c.bf16 %v1079_v8, %v1002_v7  ;;  %v1415_v10 = vpack.c.bf16 %v1078_v35, %v1006_v55  ;;  %v1641_v11 = vpop.permute.xlu1 %1640  ;;  %v1626_v12 = vpop.permute.xlu0 %1625  ;;  %vm2224_vm3 = vcmask 908288  }
 0x5c3   : > { %v1628_v14 = vunpack.i.h.bf16 %v1626_v12  ;;  %v1627_v15 = vunpack.i.l.bf16 %v1626_v12  ;;  %v1643_v16 = vunpack.i.h.bf16 %v1641_v11  ;;  %v1642_v17 = vunpack.i.l.bf16 %v1641_v11  ;;  %vm2225_vm4 = vmmov %vm2224_vm3 }
 0x5c4   : > { %1414 = vmatprep.subr.msk.bf16.mxu1 %vm1853_vm7, %v1412_v9 }
 0x5c5   : > { %v1018_v21 = vsel %vm507_vm5, %v1013_v58, %v1627_v15  ;;  %v1019_v22 = vsel %vm507_vm5, %v1627_v15, %v1628_v14  ;;  %1417 = vmatpush1.bf16.msk.msra.mxu1 %vm1863_vm9, %v1415_v10  ;;  %v1088_v34 = vsel %vm2224_vm3, %v1083_v63, %v1642_v17  ;;  %v1089_v39 = vsel %vm2225_vm4, %v1642_v17, %v1643_v16 }
 0x5c6   : > { %v1418_v23 = vpack.c.bf16 %v1031_v20, %v1019_v22  ;;  %v1421_v24 = vpack.c.bf16 %v1030_v19, %v1018_v21  ;;  %v1651_v25 = vpop.permute.xlu1 %1650  ;;  %v1636_v26 = vpop.permute.xlu0 %1635  ;;  %vm2226_vm5 = vcmask 777216  }
 0x5c7   : > { %v1638_v28 = vunpack.i.h.bf16 %v1636_v26  ;;  %v1637_v29 = vunpack.i.l.bf16 %v1636_v26  ;;  %v1653_v40 = vunpack.i.h.bf16 %v1651_v25  ;;  %v1652_v41 = vunpack.i.l.bf16 %v1651_v25  ;;  %vm2227_vm8 = vmmov %vm2226_vm5 }
 0x5c8   : > { %1420 = vmatprep.subr.msk.bf16.mxu1 %vm1887_vm13, %v1418_v23  ;;  %vm2228_vm13 = vcmask 785408  }
 0x5c9   : > { %v1042_v42 = vsel %vm533_vm12, %v1037_v61, %v1637_v29  ;;  %v1043_v43 = vsel %vm533_vm12, %v1637_v29, %v1638_v28  ;;  %1423 = vmatpush1.bf16.msk.msra.mxu1 %vm1895_vm15, %v1421_v24  ;;  %v1099_v13 = vsel %vm2226_vm5, %v1652_v41, %v1653_v40  ;;  %vm2229_vm2 = vmmov %vm2228_vm13  ;;  %vm2230_vm12 = vcmask 769024  }
 0x5ca   : > { %v1424_v44 = vpack.c.bf16 %v1043_v43, %v1089_v39  ;;  %v1427_v45 = vpack.c.bf16 %v1042_v42, %v1088_v34  ;;  %v1093_v36 = vpop.permute.xlu1 %1092  ;;  %v1646_v46 = vpop.permute.xlu0 %1645  ;;  %vm2231_vm15 = vmmov %vm2230_vm12 }
 0x5cb   : > { %v1648_v48 = vunpack.i.h.bf16 %v1646_v46  ;;  %v1647_v49 = vunpack.i.l.bf16 %v1646_v46  ;;  %v1098_v52 = vsel %vm2227_vm8, %v1093_v36, %v1652_v41 }
 0x5cc   : > { %1426 = vmatprep.subr.msk.bf16.mxu1 %vm1910_vm0, %v1424_v44 }
 0x5cd   : > { %v1054_v38 = vsel %vm2228_vm13, %v1049_v30, %v1647_v49  ;;  %v1055_v53 = vsel %vm2229_vm2, %v1647_v49, %v1648_v48  ;;  %1429 = vmatpush1.bf16.msk.msra.mxu1 %vm1917_vm14, %v1427_v45 }
 0x5ce   : > { %v1430_v18 = vpack.c.bf16 %v1099_v13, %v1055_v53  ;;  %v1433_v54 = vpack.c.bf16 %v1098_v52, %v1054_v38  ;;  %v1065_v32 = vpop.permute.xlu1 %1064  ;;  %v1063_v33 = vpop.permute.xlu0 %1062 }
 0x5cf   : > { %v1067_v27 = vsel %vm2230_vm12, %v1063_v33, %v1065_v32 }
 0x5d0   : > { %1432 = vmatprep.subr.msk.bf16.mxu1 %vm1853_vm7, %v1430_v18  ;;  %vm2232_vm7 = vcmask 588800  }
 0x5d1   : > { %1435 = vmatpush1.bf16.msk.msra.mxu1 %vm1863_vm9, %v1433_v54 }
 0x5d2   : > { %v1061_v55 = vpop.permute.xlu0 %1060  ;;  %1313 = vmatprep.subr.msk.mxu1 %vm1867_vm10, %v1067_v27 }
 0x5d3   : > { %v1066_v31 = vsel %vm2231_vm15, %v1061_v55, %v1063_v33 }
 0x5d5   : > { %1314 = vmatpush1.msk.msra.mxu1 %vm1871_vm11, %v1066_v31 }
 0x5d6   : > { %1315 = vmatmul.mubr.msk.f32.vlgmr.msra.gmra.mrb[2].mxu1 %vm2232_vm7, %v995_v56 }
 0x5df   : > { %v1106_v59 = vpop.permute.xlu1 %1105 }
 0x6a9   : > { %v1177_v7 = vpop.f32.mrb[2].mxu1 }
 0x6aa   : > { %v1178_v50 = vadd.f32 %v1177_v7, %v1106_v59  ;;  %v1179_v1 = vpop.f32.mrb[3].mxu1 }
 0x6ab   : > { %v1180_v47 = vadd.f32 %v1179_v1, %v1106_v59 }
 0x6ac   : > { %v1182_v57 = vmax.f32 %v1178_v50, 0.0 }
 0x6ad   : > { %v1183_v58 = vmax.f32 %v1180_v47, 0.0 }
 0x6af   : > { %v1186_v2 = vcombine.low %v1182_v57, %v1183_v58 }
 0x6b1   : > { %1188 = vst [vmem:[%s349_s15] sm:$0xff] %v1186_v2 }
 0x6b2 PF: > { %s19_s30 = sadd.s32 1, %s1660_s30  }
 0x6b3   : > { %p16_p4 = scmp.ge.s32.totalorder %s19_s30, 4  }
 0x6b5   :  { %18 = sbr.rel (!%p16_p4) target bundleno = 1 (0x1), region = 89 }

</bundles_post_ra>
